<compile_context>
chip_gen: v5e
topology: v5e:2x2
jax: 0.10.0
libtpu: 0.0.40
codegen_flags: <defaults>
</compile_context>

<pallas_src>
import functools

import jax
import jax.numpy as jnp
from jax import lax
from jax.experimental import pallas as pl
from jax.experimental.pallas import tpu as pltpu


def _round_up(a, b):
    return (a + b - 1) // b * b


# ---------------------------------------------------------------------------
# Fused kernel: raw image tile -> in-VMEM patch matrix -> projection matmul.
# ---------------------------------------------------------------------------
def _patch_embed_fused_kernel(w_ref, b_ref, d_ref, x_ref, o_ref, pbuf,
                              *, C, p, nW, rows, compute_dtype):
    # w_ref : (E, K)            conv weight, K ordered (kw, c, kh)
    # b_ref : (E, 1)            bias (f32)
    # d_ref : (W, p*nW)         constant de-interleave permutation matrix
    # x_ref : (1, C, rows*p, W) raw NCHW image rows covering `rows` patch rows
    # o_ref : (1, E, rows*nW)   output tile, channels-first
    # pbuf  : (K, rows*nW)      VMEM scratch: assembled patch matrix
    R = C * p
    dmat = d_ref[...]
    for i in range(rows):                                   # static unroll
        strip = x_ref[0, :, i * p:(i + 1) * p, :]           # (C, p, W)
        x2 = strip.reshape(R, strip.shape[-1]).astype(compute_dtype)
        # z[r, kw*nW + j] = x2[r, j*p + kw]  (de-interleave on the MXU; the
        # MXU has ~5x slack here, the kernel is HBM-bandwidth bound)
        z = jnp.dot(x2, dmat, preferred_element_type=jnp.float32)
        z = z.astype(compute_dtype)                          # (R, p*nW)
        for kw in range(p):                                  # static unroll
            pbuf[kw * R:(kw + 1) * R, i * nW:(i + 1) * nW] = (
                z[:, kw * nW:(kw + 1) * nW])
    acc = jnp.dot(w_ref[...], pbuf[...], preferred_element_type=jnp.float32)
    o_ref[0] = (acc + b_ref[...]).astype(o_ref.dtype)


# ---------------------------------------------------------------------------
# Fallback kernel: pre-patchified (B, K, S) input, plain projection matmul.
# ---------------------------------------------------------------------------
def _patch_embed_matmul_kernel(w_ref, b_ref, p_ref, o_ref):
    acc = jnp.dot(w_ref[...], p_ref[0], preferred_element_type=jnp.float32)
    o_ref[0] = (acc + b_ref[...]).astype(o_ref.dtype)


def patch_embed_forward(x, weight, bias, patch_size, *, compute_dtype=None,
                        force_unfused=False, max_ts=1024):
    """x: [B, C, H, W] (NCHW).  weight: [E, C, p, p] (OIHW).  bias: [E].
    Returns [B, E, H//p, W//p] in x.dtype (same as the PyTorch module)."""
    B, C, H, W = x.shape
    p = patch_size
    E = weight.shape[0]
    nH, nW = H // p, W // p
    S = nH * nW
    K = C * p * p

    # Review item: default to bf16 matmul inputs when x is f32 (f32 accum).
    if compute_dtype is None:
        compute_dtype = jnp.bfloat16 if x.dtype == jnp.float32 else x.dtype

    b_mat = bias.astype(jnp.float32).reshape(E, 1)
    cparams = pltpu.CompilerParams(
        dimension_semantics=("parallel", "parallel"),
        vmem_limit_bytes=64 << 20)

    # ---- pick patch rows per tile for the fused path -----------------------
    rows = None
    if (not force_unfused) and p % 8 == 0 and nH > 0 and nW > 0:
        for r in range(nH, 0, -1):
            if nH % r:
                continue
            ts = r * nW
            if ts > max_ts:
                continue
            # output block last dim must be a multiple of 128 or the full S
            if ts % 128 == 0 or r == nH:
                rows = r
                break

    if rows is not None:
        # -------------------- fused patchify path ---------------------------
        ts = rows * nW
        # K ordered (kw, c, kh) to match the in-kernel patch-matrix assembly.
        w_mat = weight.transpose(0, 3, 1, 2).reshape(E, K).astype(compute_dtype)
        # Constant permutation: column kw*nW + j selects input column j*p + kw.
        cols = jnp.arange(p * nW)
        src = (cols % nW) * p + (cols // nW)
        dmat = (jnp.arange(W)[:, None] == src[None, :]).astype(compute_dtype)

        kernel = functools.partial(
            _patch_embed_fused_kernel,
            C=C, p=p, nW=nW, rows=rows, compute_dtype=compute_dtype)

        out = pl.pallas_call(
            kernel,
            out_shape=jax.ShapeDtypeStruct((B, E, S), x.dtype),
            grid_spec=pltpu.PrefetchScalarGridSpec(
                num_scalar_prefetch=0,
                grid=(B, nH // rows),
                in_specs=[
                    pl.BlockSpec((E, K), lambda b, t: (0, 0)),       # resident
                    pl.BlockSpec((E, 1), lambda b, t: (0, 0)),       # resident
                    pl.BlockSpec((W, p * nW), lambda b, t: (0, 0)),  # resident
                    pl.BlockSpec((1, C, rows * p, W),
                                 lambda b, t: (b, 0, t, 0)),         # raw image
                ],
                out_specs=pl.BlockSpec((1, E, ts), lambda b, t: (b, 0, t)),
                scratch_shapes=[pltpu.VMEM((K, ts), compute_dtype)],
            ),
            compiler_params=cparams,
        )(w_mat, b_mat, dmat, x)
        return out.reshape(B, E, nH, nW)

    # ----------------- fallback: JAX-side patchify + matmul -----------------
    # (used when patch_size % 8 != 0 or no legal spatial tiling exists)
    Hc, Wc = nH * p, nW * p
    w_mat = weight.reshape(E, K).astype(compute_dtype)   # K ordered (c, kh, kw)
    # Cast before the transpose so XLA fuses cast + relayout into one pass.
    patches = (x[:, :, :Hc, :Wc].astype(compute_dtype)
               .reshape(B, C, nH, p, nW, p)
               .transpose(0, 1, 3, 5, 2, 4)
               .reshape(B, K, S))
    if S <= max_ts:
        ts, S_pad = S, S
    else:
        ts = max(128, (max_ts // 128) * 128)
        S_pad = _round_up(S, ts)
        patches = jnp.pad(patches, ((0, 0), (0, 0), (0, S_pad - S)))

    out = pl.pallas_call(
        _patch_embed_matmul_kernel,
        out_shape=jax.ShapeDtypeStruct((B, E, S_pad), x.dtype),
        grid_spec=pltpu.PrefetchScalarGridSpec(
            num_scalar_prefetch=0,
            grid=(B, S_pad // ts),
            in_specs=[
                pl.BlockSpec((E, K), lambda b, s: (0, 0)),   # resident weight
                pl.BlockSpec((E, 1), lambda b, s: (0, 0)),   # resident bias
                pl.BlockSpec((1, K, ts), lambda b, s: (b, 0, s)),
            ],
            out_specs=pl.BlockSpec((1, E, ts), lambda b, s: (b, 0, s)),
        ),
        compiler_params=cparams,
    )(w_mat, b_mat, patches)
    return out[:, :, :S].reshape(B, E, nH, nW)


if __name__ == "__main__":
    # Small, module-consistent shapes: img_size=16, patch_size=8, in_chans=4,
    # embed_dim=32, batch=2  ->  num_patches = (16//8)*(16//8) = 4.
    B, C, H, W = 2, 4, 16, 16
    P = 8
    E = 32

    key = jax.random.PRNGKey(0)
    kx, kw, kb = jax.random.split(key, 3)
    x = jax.random.normal(kx, (B, C, H, W), dtype=jnp.float32)
    weight = jax.random.normal(kw, (E, C, P, P), dtype=jnp.float32) * 0.02
    bias = jax.random.normal(kb, (E,), dtype=jnp.float32) * 0.02

    # Reference: XLA conv (NCHW, OIHW), stride == kernel == patch_size.
    ref = lax.conv_general_dilated(
        x, weight, window_strides=(P, P), padding="VALID",
        dimension_numbers=("NCHW", "OIHW", "NCHW"),
        precision=lax.Precision.HIGHEST,
    ) + bias.reshape(1, E, 1, 1)

    # Default path: fused patchify, bf16 MXU inputs, f32 accumulation.
    out = jax.block_until_ready(patch_embed_forward(x, weight, bias, P))
    assert out.shape == (B, E, H // P, W // P)
    assert jnp.allclose(out, ref, atol=5e-2, rtol=5e-2), "fused bf16 mismatch"

    # Fused path with f32 matmul inputs (MXU multi-pass f32 emulation).
    out_f32 = jax.block_until_ready(
        patch_embed_forward(x, weight, bias, P, compute_dtype=jnp.float32))
    assert jnp.allclose(out_f32, ref, atol=1e-2, rtol=1e-2), "fused f32 mismatch"

    # Unfused fallback path (JAX-side patchify), used for odd patch sizes.
    out_fb = jax.block_until_ready(
        patch_embed_forward(x, weight, bias, P, force_unfused=True))
    assert out_fb.shape == (B, E, H // P, W // P)
    assert jnp.allclose(out_fb, ref, atol=5e-2, rtol=5e-2), "fallback mismatch"

    print("KERNEL_OK")
</pallas_src>

<mosaic_0001>
module attributes {stable_mosaic.version = 11 : i64} {
  func.func @_patch_embed_fused_kernel(%arg0: i32, %arg1: i32, %arg2: memref<32x256xbf16, #tpu.memory_space<vmem>>, %arg3: memref<32x1xf32, #tpu.memory_space<vmem>>, %arg4: memref<16x16xbf16, #tpu.memory_space<vmem>>, %arg5: memref<1x4x16x16xf32, #tpu.memory_space<vmem>>, %arg6: memref<1x32x4xf32, #tpu.memory_space<vmem>>, %arg7: memref<256x4xbf16, #tpu.memory_space<vmem>>) attributes {dimension_semantics = [#tpu.dimension_semantics<parallel>, #tpu.dimension_semantics<parallel>], iteration_bounds = array<i64: 2, 1>, scalar_prefetch = 0 : i64, scratch_operands = 1 : i64, tpu.core_type = #tpu.core_type<tc>, window_params = [{pipeline_mode = #tpu.pipeline_mode<synchronous>, transform_indices = @transform_0, window_bounds = array<i64: 32, 256>}, {pipeline_mode = #tpu.pipeline_mode<synchronous>, transform_indices = @transform_1, window_bounds = array<i64: 32, 1>}, {pipeline_mode = #tpu.pipeline_mode<synchronous>, transform_indices = @transform_2, window_bounds = array<i64: 16, 16>}, {transform_indices = @transform_3, window_bounds = array<i64: 1, 4, 16, 16>}, {transform_indices = @transform_4, window_bounds = array<i64: 1, 32, 4>}]} {
    %c0 = arith.constant 0 : index
    %c0_0 = arith.constant 0 : index
    %0 = vector.load %arg4[%c0, %c0_0] : memref<16x16xbf16, #tpu.memory_space<vmem>>, vector<16x16xbf16>
    %c0_1 = arith.constant 0 : index
    %c0_2 = arith.constant 0 : index
    %c0_3 = arith.constant 0 : index
    %c0_4 = arith.constant 0 : index
    %1 = vector.load %arg5[%c0_1, %c0_2, %c0_3, %c0_4] : memref<1x4x16x16xf32, #tpu.memory_space<vmem>>, vector<1x4x8x16xf32>
    %2 = vector.shape_cast %1 : vector<1x4x8x16xf32> to vector<4x8x16xf32>
    %3 = vector.shape_cast %2 : vector<4x8x16xf32> to vector<32x16xf32>
    %4 = arith.truncf %3 : vector<32x16xf32> to vector<32x16xbf16>
    %cst = arith.constant dense<0.000000e+00> : vector<32x16xf32>
    %5 = tpu.matmul %4, %0, %cst {dimension_numbers = #tpu.dot_dimension_numbers<[1], [0], [0], [1], [0, 0, 1, 1], [], []>} : vector<32x16xbf16>, vector<16x16xbf16>, vector<32x16xf32> -> vector<32x16xf32>
    %6 = arith.truncf %5 : vector<32x16xf32> to vector<32x16xbf16>
    %7 = vector.extract_strided_slice %6 {offsets = [0, 0], sizes = [32, 2], strides = [1, 1]} : vector<32x16xbf16> to vector<32x2xbf16>
    %c0_5 = arith.constant 0 : index
    %c0_6 = arith.constant 0 : index
    %8 = vector.load %arg7[%c0_5, %c0_6] : memref<256x4xbf16, #tpu.memory_space<vmem>>, vector<32x2xbf16>
    tpu.vector_store %arg7[%c0_5, %c0_6], %7 {strides = array<i32>} : memref<256x4xbf16, #tpu.memory_space<vmem>>, vector<32x2xbf16>,
    %9 = vector.extract_strided_slice %6 {offsets = [0, 2], sizes = [32, 2], strides = [1, 1]} : vector<32x16xbf16> to vector<32x2xbf16>
    %c32 = arith.constant 32 : index
    %c0_7 = arith.constant 0 : index
    %10 = vector.load %arg7[%c32, %c0_7] : memref<256x4xbf16, #tpu.memory_space<vmem>>, vector<32x2xbf16>
    tpu.vector_store %arg7[%c32, %c0_7], %9 {strides = array<i32>} : memref<256x4xbf16, #tpu.memory_space<vmem>>, vector<32x2xbf16>,
    %11 = vector.extract_strided_slice %6 {offsets = [0, 4], sizes = [32, 2], strides = [1, 1]} : vector<32x16xbf16> to vector<32x2xbf16>
    %c64 = arith.constant 64 : index
    %c0_8 = arith.constant 0 : index
    %12 = vector.load %arg7[%c64, %c0_8] : memref<256x4xbf16, #tpu.memory_space<vmem>>, vector<32x2xbf16>
    tpu.vector_store %arg7[%c64, %c0_8], %11 {strides = array<i32>} : memref<256x4xbf16, #tpu.memory_space<vmem>>, vector<32x2xbf16>,
    %13 = vector.extract_strided_slice %6 {offsets = [0, 6], sizes = [32, 2], strides = [1, 1]} : vector<32x16xbf16> to vector<32x2xbf16>
    %c96 = arith.constant 96 : index
    %c0_9 = arith.constant 0 : index
    %14 = vector.load %arg7[%c96, %c0_9] : memref<256x4xbf16, #tpu.memory_space<vmem>>, vector<32x2xbf16>
    tpu.vector_store %arg7[%c96, %c0_9], %13 {strides = array<i32>} : memref<256x4xbf16, #tpu.memory_space<vmem>>, vector<32x2xbf16>,
    %15 = vector.extract_strided_slice %6 {offsets = [0, 8], sizes = [32, 2], strides = [1, 1]} : vector<32x16xbf16> to vector<32x2xbf16>
    %c128 = arith.constant 128 : index
    %c0_10 = arith.constant 0 : index
    %16 = vector.load %arg7[%c128, %c0_10] : memref<256x4xbf16, #tpu.memory_space<vmem>>, vector<32x2xbf16>
    tpu.vector_store %arg7[%c128, %c0_10], %15 {strides = array<i32>} : memref<256x4xbf16, #tpu.memory_space<vmem>>, vector<32x2xbf16>,
    %17 = vector.extract_strided_slice %6 {offsets = [0, 10], sizes = [32, 2], strides = [1, 1]} : vector<32x16xbf16> to vector<32x2xbf16>
    %c160 = arith.constant 160 : index
    %c0_11 = arith.constant 0 : index
    %18 = vector.load %arg7[%c160, %c0_11] : memref<256x4xbf16, #tpu.memory_space<vmem>>, vector<32x2xbf16>
    tpu.vector_store %arg7[%c160, %c0_11], %17 {strides = array<i32>} : memref<256x4xbf16, #tpu.memory_space<vmem>>, vector<32x2xbf16>,
    %19 = vector.extract_strided_slice %6 {offsets = [0, 12], sizes = [32, 2], strides = [1, 1]} : vector<32x16xbf16> to vector<32x2xbf16>
    %c192 = arith.constant 192 : index
    %c0_12 = arith.constant 0 : index
    %20 = vector.load %arg7[%c192, %c0_12] : memref<256x4xbf16, #tpu.memory_space<vmem>>, vector<32x2xbf16>
    tpu.vector_store %arg7[%c192, %c0_12], %19 {strides = array<i32>} : memref<256x4xbf16, #tpu.memory_space<vmem>>, vector<32x2xbf16>,
    %21 = vector.extract_strided_slice %6 {offsets = [0, 14], sizes = [32, 2], strides = [1, 1]} : vector<32x16xbf16> to vector<32x2xbf16>
    %c224 = arith.constant 224 : index
    %c0_13 = arith.constant 0 : index
    %22 = vector.load %arg7[%c224, %c0_13] : memref<256x4xbf16, #tpu.memory_space<vmem>>, vector<32x2xbf16>
    tpu.vector_store %arg7[%c224, %c0_13], %21 {strides = array<i32>} : memref<256x4xbf16, #tpu.memory_space<vmem>>, vector<32x2xbf16>,
    %c0_14 = arith.constant 0 : index
    %c0_15 = arith.constant 0 : index
    %c8 = arith.constant 8 : index
    %c0_16 = arith.constant 0 : index
    %23 = vector.load %arg5[%c0_14, %c0_15, %c8, %c0_16] : memref<1x4x16x16xf32, #tpu.memory_space<vmem>>, vector<1x4x8x16xf32>
    %24 = vector.shape_cast %23 : vector<1x4x8x16xf32> to vector<4x8x16xf32>
    %25 = vector.shape_cast %24 : vector<4x8x16xf32> to vector<32x16xf32>
    %26 = arith.truncf %25 : vector<32x16xf32> to vector<32x16xbf16>
    %cst_17 = arith.constant dense<0.000000e+00> : vector<32x16xf32>
    %27 = tpu.matmul %26, %0, %cst_17 {dimension_numbers = #tpu.dot_dimension_numbers<[1], [0], [0], [1], [0, 0, 1, 1], [], []>} : vector<32x16xbf16>, vector<16x16xbf16>, vector<32x16xf32> -> vector<32x16xf32>
    %28 = arith.truncf %27 : vector<32x16xf32> to vector<32x16xbf16>
    %29 = vector.extract_strided_slice %28 {offsets = [0, 0], sizes = [32, 2], strides = [1, 1]} : vector<32x16xbf16> to vector<32x2xbf16>
    %c0_18 = arith.constant 0 : index
    %c2 = arith.constant 2 : index
    %30 = vector.load %arg7[%c0_18, %c2] : memref<256x4xbf16, #tpu.memory_space<vmem>>, vector<32x2xbf16>
    tpu.vector_store %arg7[%c0_18, %c2], %29 {strides = array<i32>} : memref<256x4xbf16, #tpu.memory_space<vmem>>, vector<32x2xbf16>,
    %31 = vector.extract_strided_slice %28 {offsets = [0, 2], sizes = [32, 2], strides = [1, 1]} : vector<32x16xbf16> to vector<32x2xbf16>
    %c32_19 = arith.constant 32 : index
    %c2_20 = arith.constant 2 : index
    %32 = vector.load %arg7[%c32_19, %c2_20] : memref<256x4xbf16, #tpu.memory_space<vmem>>, vector<32x2xbf16>
    tpu.vector_store %arg7[%c32_19, %c2_20], %31 {strides = array<i32>} : memref<256x4xbf16, #tpu.memory_space<vmem>>, vector<32x2xbf16>,
    %33 = vector.extract_strided_slice %28 {offsets = [0, 4], sizes = [32, 2], strides = [1, 1]} : vector<32x16xbf16> to vector<32x2xbf16>
    %c64_21 = arith.constant 64 : index
    %c2_22 = arith.constant 2 : index
    %34 = vector.load %arg7[%c64_21, %c2_22] : memref<256x4xbf16, #tpu.memory_space<vmem>>, vector<32x2xbf16>
    tpu.vector_store %arg7[%c64_21, %c2_22], %33 {strides = array<i32>} : memref<256x4xbf16, #tpu.memory_space<vmem>>, vector<32x2xbf16>,
    %35 = vector.extract_strided_slice %28 {offsets = [0, 6], sizes = [32, 2], strides = [1, 1]} : vector<32x16xbf16> to vector<32x2xbf16>
    %c96_23 = arith.constant 96 : index
    %c2_24 = arith.constant 2 : index
    %36 = vector.load %arg7[%c96_23, %c2_24] : memref<256x4xbf16, #tpu.memory_space<vmem>>, vector<32x2xbf16>
    tpu.vector_store %arg7[%c96_23, %c2_24], %35 {strides = array<i32>} : memref<256x4xbf16, #tpu.memory_space<vmem>>, vector<32x2xbf16>,
    %37 = vector.extract_strided_slice %28 {offsets = [0, 8], sizes = [32, 2], strides = [1, 1]} : vector<32x16xbf16> to vector<32x2xbf16>
    %c128_25 = arith.constant 128 : index
    %c2_26 = arith.constant 2 : index
    %38 = vector.load %arg7[%c128_25, %c2_26] : memref<256x4xbf16, #tpu.memory_space<vmem>>, vector<32x2xbf16>
    tpu.vector_store %arg7[%c128_25, %c2_26], %37 {strides = array<i32>} : memref<256x4xbf16, #tpu.memory_space<vmem>>, vector<32x2xbf16>,
    %39 = vector.extract_strided_slice %28 {offsets = [0, 10], sizes = [32, 2], strides = [1, 1]} : vector<32x16xbf16> to vector<32x2xbf16>
    %c160_27 = arith.constant 160 : index
    %c2_28 = arith.constant 2 : index
    %40 = vector.load %arg7[%c160_27, %c2_28] : memref<256x4xbf16, #tpu.memory_space<vmem>>, vector<32x2xbf16>
    tpu.vector_store %arg7[%c160_27, %c2_28], %39 {strides = array<i32>} : memref<256x4xbf16, #tpu.memory_space<vmem>>, vector<32x2xbf16>,
    %41 = vector.extract_strided_slice %28 {offsets = [0, 12], sizes = [32, 2], strides = [1, 1]} : vector<32x16xbf16> to vector<32x2xbf16>
    %c192_29 = arith.constant 192 : index
    %c2_30 = arith.constant 2 : index
    %42 = vector.load %arg7[%c192_29, %c2_30] : memref<256x4xbf16, #tpu.memory_space<vmem>>, vector<32x2xbf16>
    tpu.vector_store %arg7[%c192_29, %c2_30], %41 {strides = array<i32>} : memref<256x4xbf16, #tpu.memory_space<vmem>>, vector<32x2xbf16>,
    %43 = vector.extract_strided_slice %28 {offsets = [0, 14], sizes = [32, 2], strides = [1, 1]} : vector<32x16xbf16> to vector<32x2xbf16>
    %c224_31 = arith.constant 224 : index
    %c2_32 = arith.constant 2 : index
    %44 = vector.load %arg7[%c224_31, %c2_32] : memref<256x4xbf16, #tpu.memory_space<vmem>>, vector<32x2xbf16>
    tpu.vector_store %arg7[%c224_31, %c2_32], %43 {strides = array<i32>} : memref<256x4xbf16, #tpu.memory_space<vmem>>, vector<32x2xbf16>,
    %c0_33 = arith.constant 0 : index
    %c0_34 = arith.constant 0 : index
    %45 = vector.load %arg2[%c0_33, %c0_34] : memref<32x256xbf16, #tpu.memory_space<vmem>>, vector<32x256xbf16>
    %c0_35 = arith.constant 0 : index
    %c0_36 = arith.constant 0 : index
    %46 = vector.load %arg7[%c0_35, %c0_36] : memref<256x4xbf16, #tpu.memory_space<vmem>>, vector<256x4xbf16>
    %cst_37 = arith.constant dense<0.000000e+00> : vector<32x4xf32>
    %47 = tpu.matmul %45, %46, %cst_37 {dimension_numbers = #tpu.dot_dimension_numbers<[1], [0], [0], [1], [0, 0, 1, 1], [], []>} : vector<32x256xbf16>, vector<256x4xbf16>, vector<32x4xf32> -> vector<32x4xf32>
    %c0_38 = arith.constant 0 : index
    %c0_39 = arith.constant 0 : index
    %48 = vector.load %arg3[%c0_38, %c0_39] : memref<32x1xf32, #tpu.memory_space<vmem>>, vector<32x1xf32>
    %49 = vector.broadcast %48 : vector<32x1xf32> to vector<32x4xf32>
    %50 = arith.addf %47, %49 : vector<32x4xf32>
    %c0_40 = arith.constant 0 : index
    %c0_41 = arith.constant 0 : index
    %c0_42 = arith.constant 0 : index
    %51 = vector.load %arg6[%c0_40, %c0_41, %c0_42] : memref<1x32x4xf32, #tpu.memory_space<vmem>>, vector<1x32x4xf32>
    %52 = vector.shape_cast %51 : vector<1x32x4xf32> to vector<32x4xf32>
    %53 = vector.shape_cast %50 : vector<32x4xf32> to vector<1x32x4xf32>
    tpu.vector_store %arg6[%c0_40, %c0_41, %c0_42], %53 {strides = array<i32>} : memref<1x32x4xf32, #tpu.memory_space<vmem>>, vector<1x32x4xf32>,
    return
  }
  func.func @transform_0(%arg0: i32, %arg1: i32) -> (i32, i32) {
    %c0_i32 = arith.constant 0 : i32
    %c0_i32_0 = arith.constant 0 : i32
    %c0_i32_1 = arith.constant 0 : i32
    return %c0_i32, %c0_i32_0 : i32, i32
  }
  func.func @transform_1(%arg0: i32, %arg1: i32) -> (i32, i32) {
    %c0_i32 = arith.constant 0 : i32
    %c0_i32_0 = arith.constant 0 : i32
    %c0_i32_1 = arith.constant 0 : i32
    return %c0_i32, %c0_i32_0 : i32, i32
  }
  func.func @transform_2(%arg0: i32, %arg1: i32) -> (i32, i32) {
    %c0_i32 = arith.constant 0 : i32
    %c0_i32_0 = arith.constant 0 : i32
    %c0_i32_1 = arith.constant 0 : i32
    return %c0_i32, %c0_i32_0 : i32, i32
  }
  func.func @transform_3(%arg0: i32, %arg1: i32) -> (i32, i32, i32, i32) {
    %c0_i32 = arith.constant 0 : i32
    %c0_i32_0 = arith.constant 0 : i32
    %c0_i32_1 = arith.constant 0 : i32
    return %arg0, %c0_i32, %arg1, %c0_i32_0 : i32, i32, i32, i32
  }
  func.func @transform_4(%arg0: i32, %arg1: i32) -> (i32, i32, i32) {
    %c0_i32 = arith.constant 0 : i32
    %c0_i32_0 = arith.constant 0 : i32
    return %arg0, %c0_i32, %arg1 : i32, i32, i32
  }
}

</mosaic_0001>

<bundles_post_ra>
// kernel: tpu_custom_call.1
= control target key start
LH: loop header
LB: loop body
LE: loop exit
PB: predicated region body
PF: predicated region fallthrough
CT: control target
= control target key end

     0   :  { %9 = vsyncpa [#allocation4], 0  ;;  %s1609_s0 = inlined_call_operand.vmem [shape: bf16[32,256], index: 0, kind: input, shape index: {}]   ;;  %s1610_s1 = inlined_call_operand.vmem [shape: f32[32,1], index: 1, kind: input, shape index: {}]   ;;  %s1611_s2 = inlined_call_operand.hbm [shape: bf16[16,16], index: 2, kind: input, shape index: {}]   ;;  %s1612_s3 = inlined_call_operand.hbm [shape: f32[2,4,16,16], index: 3, kind: input, shape index: {}]   ;;  %s1613_s4 = inlined_call_operand.vmem [shape: f32[2,32,4], index: 4, kind: output, shape index: {}]  }
   0x1   :  { %10 = vsyncpa [#allocation6], 0 }
   0x2   :  { %12 = vsyncpa [#allocation6 + $0x1], 0  ;;  %s1286_s15 = smov 0   ;;  %s1288_s16 = smov 0  }
   0x3   :  { %s1290_s17 = smov 0   ;;  %s1292_s18 = smov 0  }
   0x4   :  { %s1294_s19 = smov 0   ;;  %s1296_s20 = smov 0  }
   0x5 LB: > { %s907_s21 = sadd.s32 4294967295, %s1245_s20   ;;  %p115_p0 = scmp.ne.s32.totalorder %s1229_s16, %s1225_s15  ;;  %s1245_s20 = sphi %s1296_s20, %s18_s20   ;;  %s1241_s19 = sphi %s1294_s19, %s1622_s19   ;;  %s1237_s18 = sphi %s1292_s18, %s1621_s18   ;;  %s1233_s17 = sphi %s1290_s17, %s1620_s17   ;;  %s1229_s16 = sphi %s1288_s16, %s1619_s16   ;;  %s1225_s15 = sphi %s1286_s15, %s1618_s15  }
   0x6   : > { %p1316_p1 = scmp.eq.s32.totalorder %s907_s21, 0  ;;  %p909_p2 = scmp.ge.s32.totalorder %s1245_s20, 1 }
   0x7   : > { %p154_p3 = scmp.lt.s32.totalorder %s1245_s20, 3  ;;  %s171_s26 = sshll.u32 %s1611_s2, 4  ;;  %s172_s26 = int_to_ptr.hbm [resolvable:$true] %s171_s26 }
   0x8   : > { %p1324_p4 = por %p1316_p1, %p115_p0  ;;  %s1247_s28 = smov [#allocation3]  }
   0x9   : > { %p1331_p5 = pnand %p909_p2, %p154_p3  ;;  %s173_s29 = sshll.u32 %s1247_s28, 4  ;;  %s174_s29 = int_to_ptr.vmem [resolvable:$true] %s173_s29 }
   0xa   : > { %s1248_s30 = smov 64   ;;  %s1249_s5 = smov 4  }
   0xb   : > { %p1055_p6 = pneg %p1331_p5  ;;  %s30_s6 = sadd.s32 1, %s1241_s19 }
   0xc   : > { %p32_p8 = scmp.ge.s32.totalorder %s30_s6, 2  ;;  %s102_s7 = sadd.s32 1, %s1233_s17 }
   0xd   : > { %p1056_p7 = pnand %p1055_p6, %p1316_p1  ;;  %p109_p9 = scmp.ne.s32.totalorder %s1233_s17, %s1229_s16 }
   0xe   : > { %p110_p10 = scmp.eq.s32.totalorder %s1245_s20, 0  ;;  %s1624_s6 = smov (%p32_p8, %s30_s6), 0 }
   0xf   : > { %1058 = dma.hbm_to_vmem [thread:$0]  (!%p1056_p7), %s172_s26, 128, %s174_s29, [#allocation4], %s1248_s30, %s1248_s30, %s1249_s5  }
  0x10   : > { %p1346_p11 = por %p110_p10, %p109_p9  ;;  %p1064_p12 = scmp.lt.s32.totalorder %s1245_s20, 2 }
  0x11   : > { %s97_s9 = ssub.s32 %s1241_s19, %s1624_s6  ;;  %s187_s10 = sand.u32 1, %s1233_s17  }
  0x12   : > { %p100_p13 = scmp.eq.s32.totalorder %s97_s9, 0  ;;  %s912_s11 = sshll.u32 %s187_s10, 6 }
  0x13   : > { %s1010_s12 = sshll.u32 %s1241_s19, 6  ;;  %s191_s25 = scalar_lea.vmem [#allocation5], %s912_s11 }
  0x14   : > { %s1356_s13 = scalar_select %p100_p13, %s1233_s17, %s102_s7  }
  0x15   : > { %s198_s21 = scalar_lea.hbm %s1612_s3, %s1010_s12  ;;  %s201_s26 = sshll.u32 %s191_s25, 4  ;;  %s202_s26 = int_to_ptr.vmem [resolvable:$true] %s201_s26 }
  0x16   : > { %s199_s24 = sshll.u32 %s198_s21, 4  ;;  %p1060_p0 = pnand %p1064_p12, %p1346_p11  ;;  %s200_s24 = int_to_ptr.hbm [resolvable:$true] %s199_s24 }
  0x17   : > { %s188_s28 = scalar_lea.sflag [#allocation6], %s187_s10  ;;  %s1250_s29 = smov 128  }
  0x18   : > { %s1251_s30 = smov 8   ;;  %213 = sbr.rel (%p1331_p5) target bundleno = 580 (0x244), region = 36 }
  0x19   : > { %1062 = dma.hbm_to_vmem [thread:$0]  (!%p1060_p0), %s200_s24, 1024, %s202_s26, %s188_s28, %s1250_s29, %s1250_s29, %s1251_s30  }
  0x1d   : > { %1216 = dma.done.wait (%p1316_p1), [#allocation4], 128  }
  0x1e   : > { %1218 = vsyncadd (%p1316_p1), [#allocation4], 4294967168  ;;  %s220_s5 = sand.u32 1, %s1229_s16  }
  0x1f   : > { %s917_s7 = sshll.u32 %s220_s5, 6  ;;  %s221_s8 = scalar_lea.sflag [#allocation6], %s220_s5 }
  0x20   : > { %s224_s9 = scalar_lea.vmem [#allocation5], %s917_s7 }
  0x21   : > { %1220 = dma.done.wait (%p1324_p4), %s221_s8, 1024  }
  0x22   : > { %1222 = vsyncadd (%p1324_p4), %s221_s8, 4294966272  ;;  %v1012_v0 = vld [vmem:[#allocation3] sm:$0xff]  ;;  %v265_v1 = vld [vmem:[%s224_s9] sm:$0xff]  ;;  %vm277_vm0 = vcmask 130048   ;;  %vm307_vm1 = vcmask 11264   ;;  %s1252_s22 = smov 124  }
  0x23   : > { %v266_v2 = vld [vmem:[%s224_s9 + $0x10] sm:$0xff]  ;;  %v428_v4 = vld [vmem:[%s224_s9 + $0x8] sm:$0xff]  ;;  %v429_v5 = vld [vmem:[%s224_s9 + $0x18] sm:$0xff]  ;;  %291 = vmatpush.bf16.msra.mxu0 %v1012_v0  ;;  %447 = vmatpush.bf16.msra.mxu1 %v1012_v0  ;;  %s1253_s23 = smov 114   ;;  %s1254_s27 = smov 122   ;;  %vm479_vm2 = vcmask 27664  }
  0x24   : > { %v269_v3 = vpack.c.bf16 %v266_v2, %v265_v1  ;;  %v432_v6 = vpack.c.bf16 %v429_v5, %v428_v4  ;;  %v430_v7 = vld [vmem:[%s224_s9 + $0x28] sm:$0xff]  ;;  %v431_v8 = vld [vmem:[%s224_s9 + $0x38] sm:$0xff]  ;;  %v267_v9 = vld [vmem:[%s224_s9 + $0x20] sm:$0xff]  ;;  %s1255_s10 = smov 116   ;;  %s1256_s11 = smov 118   ;;  %vm798_vm3 = vcmask 31744  }
  0x25   : > { %v268_v10 = vld [vmem:[%s224_s9 + $0x30] sm:$0xff]  ;;  %v433_v11 = vpack.c.bf16 %v431_v8, %v430_v7  ;;  %s1257_s12 = smov 126   ;;  %s1258_s14 = smov 120  }
  0x26   : > { %924 = vmatmul.msk.bf16.vlgmr.msra.gmra.mxu0 %vm277_vm0, %v269_v3  ;;  %926 = vmatmul.msk.bf16.vlgmr.msra.gmra.mxu1 %vm277_vm0, %v432_v6  ;;  %v270_v12 = vpack.c.bf16 %v268_v10, %v267_v9  ;;  %s1259_s15 = smov 2   ;;  %p254_p1 = scmp.lt.s32.totalorder %s1237_s18, 1 }
  0x28   : > { %s1626_s18 = smov (!%p254_p1, %s1237_s18), 1 }
  0x29   : > { %s1011_s29 = sshll.u32 %s1626_s18, 5 }
  0x2a   : > { %s261_s7 = scalar_lea.vmem %s1613_s4, %s1011_s29 }
  0x36   : > { %927 = vmatmul.msk.bf16.gmra.mxu1 %vm277_vm0, %v433_v11  ;;  %925 = vmatmul.msk.bf16.gmra.mxu0 %vm277_vm0, %v270_v12 }
  0xa3   : > { %v293_v13 = vpop.f32.mrf.mxu0  ;;  %v449_v14 = vpop.f32.mrf.mxu1 }
  0xa4   : > { %v303_v15 = vpack.c.bf16 %v293_v13, %v293_v13  ;;  %v1376_v16 = vpack.c.bf16 %v449_v14, %v449_v14 }
  0xa6   : > { %504 = vrot.lane.b32.xlu1 %v1376_v16, %s1252_s22  ;;  %412 = vrot.lane.b32.xlu0 %v303_v15, %s1253_s23  ;;  %308 = vst.msk [vmem:[#allocation2] sm:$0xf] %vm307_vm1, %v303_v15 }
  0xa7   : > { %348 = vrot.lane.b32.xlu2 %v303_v15, %s1254_s27 }
  0xab   : > { %v295_v17 = vpop.f32.mrf.mxu0  ;;  %v451_v23 = vpop.f32.mrf.mxu1 }
  0xac   : > { %v1383_v18 = vpack.c.bf16 %v295_v17, %v295_v17  ;;  %v1408_v24 = vpack.c.bf16 %v451_v23, %v451_v23 }
  0xae   : > { %396 = vrot.lane.b32.xlu1 %v303_v15, %s1255_s10  ;;  %332 = vrot.lane.b32.xlu0 %v303_v15, %s1252_s22  ;;  %309 = vst.msk [vmem:[#allocation2 + $0x4] sm:$0xf] %vm307_vm1, %v1383_v18 }
  0xaf   : > { %568 = vrot.lane.b32.xlu2 %v1376_v16, %s1255_s10 }
  0xb3   : > { %v298_v19 = vpop.f32.mrf.mxu0  ;;  %v454_v25 = vpop.f32.mrf.mxu1 }
  0xb4   : > { %v305_v20 = vpack.c.bf16 %v298_v19, %v298_v19  ;;  %v1428_v26 = vpack.c.bf16 %v454_v25, %v454_v25  ;;  %v621_v19 = vld [vmem:[%s1610_s1 + $0x8] sm:$0xff] }
  0xb6   : > { %380 = vrot.lane.b32.xlu1 %v303_v15, %s1256_s11  ;;  %552 = vrot.lane.b32.xlu0 %v1376_v16, %s1256_s11  ;;  %310 = vst.msk [vmem:[#allocation2 + $0x8] sm:$0xf] %vm307_vm1, %v305_v20 }
  0xb7   : > { %488 = vrot.lane.b32.xlu2 %v1376_v16, %s1257_s12 }
  0xbb   : > { %v300_v21 = vpop.f32.mrf.mxu0  ;;  %v456_v28 = vpop.f32.mrf.mxu1 }
  0xbc   : > { %v306_v22 = vpack.c.bf16 %v300_v21, %v300_v21  ;;  %v1453_v30 = vpack.c.bf16 %v456_v28, %v456_v28  ;;  %v1260_v21 = vmov 0  }
  0xbd   : > { %1130 = vset.pattern.permute.xlu1 %v1260_v21  ;;  %1129 = vset.pattern.permute.xlu0 %v1260_v21 }
  0xbe   : > { %364 = vrot.lane.b32.xlu1 %v303_v15, %s1258_s14  ;;  %536 = vrot.lane.b32.xlu0 %v1376_v16, %s1258_s14  ;;  %311 = vst.msk [vmem:[#allocation2 + $0xc] sm:$0xf] %vm307_vm1, %v306_v22 }
  0xbf   : > { %316 = vrot.lane.b32.xlu2 %v303_v15, %s1257_s12 }
  0xc0   : > { %1128 = vset.pattern.permute.xlu2 %v1260_v21 }
  0xc6   : > { %414 = vrot.lane.b32.xlu1 %v1383_v18, %s1253_s23  ;;  %350 = vrot.lane.b32.xlu0 %v1383_v18, %s1254_s27 }
  0xc7   : > { %467 = vrot.lane.b32.xlu2 %v1376_v16, %s1259_s15 }
  0xce   : > { %334 = vrot.lane.b32.xlu1 %v1383_v18, %s1252_s22  ;;  %570 = vrot.lane.b32.xlu0 %v1408_v24, %s1255_s10 }
  0xcf   : > { %506 = vrot.lane.b32.xlu2 %v1408_v24, %s1252_s22 }
  0xd6   : > { %554 = vrot.lane.b32.xlu1 %v1408_v24, %s1256_s11  ;;  %490 = vrot.lane.b32.xlu0 %v1408_v24, %s1257_s12 }
  0xd7   : > { %398 = vrot.lane.b32.xlu2 %v1383_v18, %s1255_s10 }
  0xde   : > { %538 = vrot.lane.b32.xlu1 %v1408_v24, %s1258_s14  ;;  %318 = vrot.lane.b32.xlu0 %v1383_v18, %s1257_s12 }
  0xdf   : > { %382 = vrot.lane.b32.xlu2 %v1383_v18, %s1256_s11 }
  0xe6   : > { %508 = vrot.lane.b32.xlu1 %v1428_v26, %s1252_s22  ;;  %469 = vrot.lane.b32.xlu0 %v1408_v24, %s1259_s15 }
  0xe7   : > { %416 = vrot.lane.b32.xlu2 %v305_v20, %s1253_s23 }
  0xee   : > { %336 = vrot.lane.b32.xlu1 %v305_v20, %s1252_s22  ;;  %352 = vrot.lane.b32.xlu0 %v305_v20, %s1254_s27 }
  0xef   : > { %400 = vrot.lane.b32.xlu2 %v305_v20, %s1255_s10 }
  0xf6   : > { %556 = vrot.lane.b32.xlu1 %v1428_v26, %s1256_s11  ;;  %572 = vrot.lane.b32.xlu0 %v1428_v26, %s1255_s10 }
  0xf7   : > { %320 = vrot.lane.b32.xlu2 %v305_v20, %s1257_s12 }
  0xfe   : > { %384 = vrot.lane.b32.xlu1 %v305_v20, %s1256_s11  ;;  %492 = vrot.lane.b32.xlu0 %v1428_v26, %s1257_s12 }
  0xff   : > { %471 = vrot.lane.b32.xlu2 %v1428_v26, %s1259_s15 }
 0x101   : > { %v349_v27 = vpop.permute.xlu2 %348 }
 0x102   : > { %360 = vst.msk [vmem:[#allocation2 + $0x30] sm:$0xf] %vm307_vm1, %v349_v27 }
 0x106   : > { %368 = vrot.lane.b32.xlu1 %v305_v20, %s1258_s14  ;;  %540 = vrot.lane.b32.xlu0 %v1428_v26, %s1258_s14 }
 0x107   : > { %418 = vrot.lane.b32.xlu2 %v306_v22, %s1253_s23 }
 0x109   : > { %v569_v29 = vpop.permute.xlu2 %568 }
 0x10e   : > { %510 = vrot.lane.b32.xlu1 %v1453_v30, %s1252_s22  ;;  %524 = vrot.lane.b32.xlu0 %v1428_v26, %s1254_s27 }
 0x10f   : > { %338 = vrot.lane.b32.xlu2 %v306_v22, %s1252_s22 }
 0x111   : > { %v489_v31 = vpop.permute.xlu2 %488 }
 0x116   : > { %574 = vrot.lane.b32.xlu1 %v1453_v30, %s1255_s10  ;;  %354 = vrot.lane.b32.xlu0 %v306_v22, %s1254_s27 }
 0x117   : > { %558 = vrot.lane.b32.xlu2 %v1453_v30, %s1256_s11 }
 0x118   : > { %v505_v32 = vpop.permute.xlu1 %504  ;;  %v413_v33 = vpop.permute.xlu0 %412 }
 0x119   : > { %516 = vst.msk [vmem:[#allocation2 + $0x30] sm:$0xf] %vm479_vm2, %v505_v32  ;;  %v317_v34 = vpop.permute.xlu2 %316 }
 0x11a   : > { %424 = vst.msk [vmem:[#allocation2 + $0x70] sm:$0xf] %vm307_vm1, %v413_v33  ;;  %v623_v33 = vld [vmem:[%s1610_s1 + $0x18] sm:$0xff] }
 0x11b   : > { %580 = vst.msk [vmem:[#allocation2 + $0x70] sm:$0xf] %vm479_vm2, %v569_v29 }
 0x11c   : > { %328 = vst.msk [vmem:[#allocation2 + $0x10] sm:$0xf] %vm307_vm1, %v317_v34 }
 0x11d   : > { %484 = vst.msk [vmem:[#allocation2 + $0x10] sm:$0xf] %vm479_vm2, %v1376_v16 }
 0x11e   : > { %494 = vrot.lane.b32.xlu1 %v1453_v30, %s1257_s12  ;;  %402 = vrot.lane.b32.xlu0 %v306_v22, %s1255_s10 }
 0x11f   : > { %386 = vrot.lane.b32.xlu2 %v306_v22, %s1256_s11 }
 0x120   : > { %v397_v35 = vpop.permute.xlu1 %396  ;;  %v333_v36 = vpop.permute.xlu0 %332 }
 0x121   : > { %408 = vst.msk [vmem:[#allocation2 + $0x60] sm:$0xf] %vm307_vm1, %v397_v35  ;;  %v468_v37 = vpop.permute.xlu2 %467 }
 0x122   : > { %344 = vst.msk [vmem:[#allocation2 + $0x20] sm:$0xf] %vm307_vm1, %v333_v36 }
 0x123   : > { %500 = vst.msk [vmem:[#allocation2 + $0x20] sm:$0xf] %vm479_vm2, %v489_v31 }
 0x124   : > { %480 = vst.msk [vmem:[#allocation2] sm:$0xf] %vm479_vm2, %v468_v37 }
 0x126   : > { %542 = vrot.lane.b32.xlu1 %v1453_v30, %s1258_s14  ;;  %322 = vrot.lane.b32.xlu0 %v306_v22, %s1257_s12 }
 0x127   : > { %370 = vrot.lane.b32.xlu2 %v306_v22, %s1258_s14 }
 0x128   : > { %v381_v38 = vpop.permute.xlu1 %380  ;;  %v553_v39 = vpop.permute.xlu0 %552 }
 0x129   : > { %392 = vst.msk [vmem:[#allocation2 + $0x50] sm:$0xf] %vm307_vm1, %v381_v38  ;;  %v507_v40 = vpop.permute.xlu2 %506 }
 0x12a   : > { %564 = vst.msk [vmem:[#allocation2 + $0x60] sm:$0xf] %vm479_vm2, %v553_v39 }
 0x12e   : > { %526 = vrot.lane.b32.xlu1 %v1453_v30, %s1254_s27  ;;  %473 = vrot.lane.b32.xlu0 %v1453_v30, %s1259_s15 }
 0x12f   : > { %366 = vrot.lane.b32.xlu2 %v1383_v18, %s1258_s14  ;;  %v622_v18 = vld [vmem:[%s1610_s1 + $0x10] sm:$0xff] }
 0x130   : > { %v365_v41 = vpop.permute.xlu1 %364  ;;  %v537_v42 = vpop.permute.xlu0 %536 }
 0x131   : > { %376 = vst.msk [vmem:[#allocation2 + $0x40] sm:$0xf] %vm307_vm1, %v365_v41  ;;  %v399_v43 = vpop.permute.xlu2 %398  ;;  %v1014_v41 = vld [vmem:[%s1609_s0 + $0x4] sm:$0xf0] }
 0x132   : > { %548 = vst.msk [vmem:[#allocation2 + $0x50] sm:$0xf] %vm479_vm2, %v537_v42  ;;  %v938_v42 = vld [vmem:[%s1609_s0 + $0x10] sm:$0xf] }
 0x133   : > { %409 = vst.msk [vmem:[#allocation2 + $0x64] sm:$0xf] %vm307_vm1, %v399_v43  ;;  %v1016_v43 = vld [vmem:[%s1609_s0 + $0x14] sm:$0xf0] }
 0x136   : > { %522 = vrot.lane.b32.xlu1 %v1408_v24, %s1254_s27  ;;  %520 = vrot.lane.b32.xlu0 %v1376_v16, %s1254_s27 }
 0x138   : > { %v415_v44 = vpop.permute.xlu1 %414  ;;  %v351_v45 = vpop.permute.xlu0 %350 }
 0x139   : > { %v383_v46 = vpop.permute.xlu2 %382  ;;  %425 = vst.msk [vmem:[#allocation2 + $0x74] sm:$0xf] %vm307_vm1, %v415_v44 }
 0x13a   : > { %393 = vst.msk [vmem:[#allocation2 + $0x54] sm:$0xf] %vm307_vm1, %v383_v46  ;;  %v932_v46 = vld [vmem:[%s1609_s0 + $0x8] sm:$0xf0] }
 0x13b   : > { %361 = vst.msk [vmem:[#allocation2 + $0x34] sm:$0xf] %vm307_vm1, %v351_v45  ;;  %v1013_v45 = vld [vmem:[%s1609_s0 + $0x4] sm:$0xf] }
 0x13c   : > { %517 = vst.msk [vmem:[#allocation2 + $0x34] sm:$0xf] %vm479_vm2, %v507_v40  ;;  %v930_v40 = vld [vmem:[%s1609_s0] sm:$0xf] }
 0x13e   : > { %636 = vperm.xlu1 %1130, %v622_v18   ;;  %631 = vperm.xlu0 %1129, %v621_v19  }
 0x140   : > { %v335_v47 = vpop.permute.xlu1 %334  ;;  %v571_v48 = vpop.permute.xlu0 %570 }
 0x141   : > { %345 = vst.msk [vmem:[#allocation2 + $0x24] sm:$0xf] %vm307_vm1, %v335_v47  ;;  %v417_v49 = vpop.permute.xlu2 %416  ;;  %v1015_v47 = vld [vmem:[%s1609_s0 + $0x14] sm:$0xf] }
 0x142   : > { %581 = vst.msk [vmem:[#allocation2 + $0x74] sm:$0xf] %vm479_vm2, %v571_v48  ;;  %v940_v48 = vld [vmem:[%s1609_s0 + $0x18] sm:$0xf0] }
 0x143   : > { %426 = vst.msk [vmem:[#allocation2 + $0x78] sm:$0xf] %vm307_vm1, %v417_v49  ;;  %v1023_v20 = vld [vmem:[#allocation2 + $0x30] sm:$0xff]  ;;  %v931_v49 = vor.u32 %v1014_v41, %v930_v40 }
 0x148   : > { %v555_v50 = vpop.permute.xlu1 %554  ;;  %v491_v51 = vpop.permute.xlu0 %490 }
 0x149   : > { %565 = vst.msk [vmem:[#allocation2 + $0x64] sm:$0xf] %vm479_vm2, %v555_v50  ;;  %v401_v52 = vpop.permute.xlu2 %400  ;;  %v1031_v17 = vld [vmem:[#allocation2 + $0x70] sm:$0xff]  ;;  %v939_v50 = vor.u32 %v1016_v43, %v938_v42 }
 0x14a   : > { %501 = vst.msk [vmem:[#allocation2 + $0x24] sm:$0xf] %vm479_vm2, %v491_v51 }
 0x14b   : > { %410 = vst.msk [vmem:[#allocation2 + $0x68] sm:$0xf] %vm307_vm1, %v401_v52  ;;  %v935_v52 = vor.u32 %v1013_v45, %v932_v46 }
 0x150   : > { %v539_v53 = vpop.permute.xlu1 %538  ;;  %v319_v54 = vpop.permute.xlu0 %318  ;;  %v1029_v27 = vld [vmem:[#allocation2 + $0x60] sm:$0xff] }
 0x151   : > { %549 = vst.msk [vmem:[#allocation2 + $0x54] sm:$0xf] %vm479_vm2, %v539_v53  ;;  %v321_v55 = vpop.permute.xlu2 %320  ;;  %v1021_v28 = vld [vmem:[#allocation2 + $0x20] sm:$0xff]  ;;  %v943_v53 = vor.u32 %v1015_v47, %v940_v48 }
 0x152   : > { %329 = vst.msk [vmem:[#allocation2 + $0x14] sm:$0xf] %vm307_vm1, %v319_v54 }
 0x153   : > { %485 = vst.msk [vmem:[#allocation2 + $0x14] sm:$0xf] %vm479_vm2, %v1408_v24  ;;  %v620_v24 = vld [vmem:[%s1610_s1] sm:$0xff] }
 0x154   : > { %330 = vst.msk [vmem:[#allocation2 + $0x18] sm:$0xf] %vm307_vm1, %v321_v55  ;;  %626 = vperm.xlu2 %1128, %v620_v24  }
 0x155   : > { %486 = vst.msk [vmem:[#allocation2 + $0x18] sm:$0xf] %vm479_vm2, %v1428_v26 }
 0x158   : > { %v509_v56 = vpop.permute.xlu1 %508  ;;  %v470_v57 = vpop.permute.xlu0 %469  ;;  %v1027_v34 = vld [vmem:[#allocation2 + $0x50] sm:$0xff] }
 0x159   : > { %481 = vst.msk [vmem:[#allocation2 + $0x4] sm:$0xf] %vm479_vm2, %v470_v57  ;;  %v472_v58 = vpop.permute.xlu2 %471 }
 0x15a   : > { %482 = vst.msk [vmem:[#allocation2 + $0x8] sm:$0xf] %vm479_vm2, %v472_v58  ;;  %v1019_v35 = vld [vmem:[#allocation2 + $0x10] sm:$0xff] }
 0x15c   : > { %641 = vperm.xlu2 %1128, %v623_v33  }
 0x160   : > { %v337_v59 = vpop.permute.xlu1 %336  ;;  %v353_v60 = vpop.permute.xlu0 %352  ;;  %v1017_v44 = vld [vmem:[#allocation2] sm:$0xff] }
 0x161   : > { %346 = vst.msk [vmem:[#allocation2 + $0x28] sm:$0xf] %vm307_vm1, %v337_v59  ;;  %v419_v61 = vpop.permute.xlu2 %418 }
 0x162   : > { %362 = vst.msk [vmem:[#allocation2 + $0x38] sm:$0xf] %vm307_vm1, %v353_v60 }
 0x163   : > { %518 = vst.msk [vmem:[#allocation2 + $0x38] sm:$0xf] %vm479_vm2, %v509_v56 }
 0x164   : > { %427 = vst.msk [vmem:[#allocation2 + $0x7c] sm:$0xf] %vm307_vm1, %v419_v61 }
 0x168   : > { %v557_v62 = vpop.permute.xlu1 %556  ;;  %v573_v63 = vpop.permute.xlu0 %572 }
 0x169   : > { %566 = vst.msk [vmem:[#allocation2 + $0x68] sm:$0xf] %vm479_vm2, %v557_v62  ;;  %v339_v0 = vpop.permute.xlu2 %338 }
 0x16a   : > { %582 = vst.msk [vmem:[#allocation2 + $0x78] sm:$0xf] %vm479_vm2, %v573_v63 }
 0x16b   : > { %347 = vst.msk [vmem:[#allocation2 + $0x2c] sm:$0xf] %vm307_vm1, %v339_v0 }
 0x170   : > { %v385_v1 = vpop.permute.xlu1 %384  ;;  %v493_v2 = vpop.permute.xlu0 %492 }
 0x171   : > { %394 = vst.msk [vmem:[#allocation2 + $0x58] sm:$0xf] %vm307_vm1, %v385_v1  ;;  %v559_v3 = vpop.permute.xlu2 %558 }
 0x172   : > { %502 = vst.msk [vmem:[#allocation2 + $0x28] sm:$0xf] %vm479_vm2, %v493_v2 }
 0x178   : > { %v369_v4 = vpop.permute.xlu1 %368  ;;  %v541_v5 = vpop.permute.xlu0 %540 }
 0x179   : > { %378 = vst.msk [vmem:[#allocation2 + $0x48] sm:$0xf] %vm307_vm1, %v369_v4  ;;  %v387_v6 = vpop.permute.xlu2 %386 }
 0x17a   : > { %550 = vst.msk [vmem:[#allocation2 + $0x58] sm:$0xf] %vm479_vm2, %v541_v5 }
 0x17b   : > { %395 = vst.msk [vmem:[#allocation2 + $0x5c] sm:$0xf] %vm307_vm1, %v387_v6 }
 0x180   : > { %v511_v7 = vpop.permute.xlu1 %510  ;;  %v525_v8 = vpop.permute.xlu0 %524 }
 0x181   : > { %534 = vst.msk [vmem:[#allocation2 + $0x48] sm:$0xf] %vm479_vm2, %v525_v8  ;;  %v371_v9 = vpop.permute.xlu2 %370 }
 0x182   : > { %379 = vst.msk [vmem:[#allocation2 + $0x4c] sm:$0xf] %vm307_vm1, %v371_v9 }
 0x188   : > { %v575_v10 = vpop.permute.xlu1 %574  ;;  %v355_v11 = vpop.permute.xlu0 %354 }
 0x189   : > { %583 = vst.msk [vmem:[#allocation2 + $0x7c] sm:$0xf] %vm479_vm2, %v575_v10  ;;  %v367_v12 = vpop.permute.xlu2 %366 }
 0x18a   : > { %377 = vst.msk [vmem:[#allocation2 + $0x44] sm:$0xf] %vm307_vm1, %v367_v12 }
 0x18b   : > { %363 = vst.msk [vmem:[#allocation2 + $0x3c] sm:$0xf] %vm307_vm1, %v355_v11 }
 0x18c   : > { %519 = vst.msk [vmem:[#allocation2 + $0x3c] sm:$0xf] %vm479_vm2, %v511_v7 }
 0x190   : > { %v495_v13 = vpop.permute.xlu1 %494  ;;  %v403_v14 = vpop.permute.xlu0 %402  ;;  %v1032_v15 = vld [vmem:[#allocation2 + $0x78] sm:$0xff] }
 0x191   : > { %503 = vst.msk [vmem:[#allocation2 + $0x2c] sm:$0xf] %vm479_vm2, %v495_v13  ;;  %779 = vmatpush.bf16.msrb.mxu1 %v1032_v15  ;;  %1041 = vmatpush.bf16.msra.mxu3 %v1032_v15 }
 0x192   : > { %411 = vst.msk [vmem:[#allocation2 + $0x6c] sm:$0xf] %vm307_vm1, %v403_v14 }
 0x193   : > { %567 = vst.msk [vmem:[#allocation2 + $0x6c] sm:$0xf] %vm479_vm2, %v559_v3  ;;  %v1024_v16 = vld [vmem:[#allocation2 + $0x38] sm:$0xff] }
 0x194   : > { %760 = vmatpush.bf16.msrb.mxu0 %v1024_v16  ;;  %1033 = vmatpush.bf16.msra.mxu2 %v1024_v16 }
 0x195   : > { %780 = vmatpush.bf16.msrb.mxu1 %v1031_v17  ;;  %1042 = vmatpush.bf16.msra.mxu3 %v1031_v17 }
 0x198   : > { %v543_v22 = vpop.permute.xlu1 %542  ;;  %v323_v23 = vpop.permute.xlu0 %322  ;;  %761 = vmatpush.bf16.msrb.mxu0 %v1023_v20  ;;  %1034 = vmatpush.bf16.msra.mxu2 %v1023_v20  ;;  %v1022_v25 = vld [vmem:[#allocation2 + $0x28] sm:$0xff] }
 0x199   : > { %551 = vst.msk [vmem:[#allocation2 + $0x5c] sm:$0xf] %vm479_vm2, %v543_v22 }
 0x19a   : > { %331 = vst.msk [vmem:[#allocation2 + $0x1c] sm:$0xf] %vm307_vm1, %v323_v23  ;;  %v1030_v26 = vld [vmem:[#allocation2 + $0x68] sm:$0xff] }
 0x19b   : > { %487 = vst.msk [vmem:[#allocation2 + $0x1c] sm:$0xf] %vm479_vm2, %v1453_v30  ;;  %781 = vmatpush.bf16.msrb.mxu1 %v1030_v26  ;;  %1043 = vmatpush.bf16.msra.mxu3 %v1030_v26 }
 0x19c   : > { %762 = vmatpush.bf16.msrb.mxu0 %v1022_v25  ;;  %1035 = vmatpush.bf16.msra.mxu2 %v1022_v25 }
 0x19f   : > { %782 = vmatpush.bf16.msrb.mxu1 %v1029_v27  ;;  %1044 = vmatpush.bf16.msra.mxu3 %v1029_v27 }
 0x1a0   : > { %v527_v29 = vpop.permute.xlu1 %526  ;;  %v474_v31 = vpop.permute.xlu0 %473  ;;  %v1028_v32 = vld [vmem:[#allocation2 + $0x58] sm:$0xff]  ;;  %763 = vmatpush.bf16.msrb.mxu0 %v1021_v28  ;;  %1036 = vmatpush.bf16.msra.mxu2 %v1021_v28 }
 0x1a1   : > { %535 = vst.msk [vmem:[#allocation2 + $0x4c] sm:$0xf] %vm479_vm2, %v527_v29 }
 0x1a2   : > { %483 = vst.msk [vmem:[#allocation2 + $0xc] sm:$0xf] %vm479_vm2, %v474_v31  ;;  %v1020_v30 = vld [vmem:[#allocation2 + $0x18] sm:$0xff] }
 0x1a3   : > { %783 = vmatpush.bf16.msrb.mxu1 %v1028_v32  ;;  %1045 = vmatpush.bf16.msra.mxu3 %v1028_v32 }
 0x1a4   : > { %764 = vmatpush.bf16.msrb.mxu0 %v1020_v30  ;;  %1037 = vmatpush.bf16.msra.mxu2 %v1020_v30 }
 0x1a7   : > { %784 = vmatpush.bf16.msrb.mxu1 %v1027_v34  ;;  %1046 = vmatpush.bf16.msra.mxu3 %v1027_v34 }
 0x1a8   : > { %v523_v36 = vpop.permute.xlu1 %522  ;;  %v521_v37 = vpop.permute.xlu0 %520  ;;  %v1026_v38 = vld [vmem:[#allocation2 + $0x48] sm:$0xff]  ;;  %765 = vmatpush.bf16.msrb.mxu0 %v1019_v35  ;;  %1038 = vmatpush.bf16.msra.mxu2 %v1019_v35 }
 0x1a9   : > { %533 = vst.msk [vmem:[#allocation2 + $0x44] sm:$0xf] %vm479_vm2, %v523_v36  ;;  %v1018_v39 = vld [vmem:[#allocation2 + $0x8] sm:$0xff] }
 0x1aa   : > { %532 = vst.msk [vmem:[#allocation2 + $0x40] sm:$0xf] %vm479_vm2, %v521_v37 }
 0x1ab   : > { %785 = vmatpush.bf16.msrb.mxu1 %v1026_v38  ;;  %1047 = vmatpush.bf16.msra.mxu3 %v1026_v38 }
 0x1ac   : > { %766 = vmatpush.bf16.msrb.mxu0 %v1018_v39  ;;  %1039 = vmatpush.bf16.msra.mxu2 %v1018_v39 }
 0x1ae   : > { %v627_v54 = vpop.permute.xlu2 %626 }
 0x1b0   : > { %767 = vmatpush.bf16.msrb.mxu0 %v1017_v44  ;;  %1040 = vmatpush.bf16.msra.mxu2 %v1017_v44  ;;  %v637_v59 = vpop.permute.xlu1 %636  ;;  %v632_v61 = vpop.permute.xlu0 %631 }
 0x1b1   : > { %v1025_v51 = vld [vmem:[#allocation2 + $0x40] sm:$0xff] }
 0x1b2   : > { %786 = vmatpush.bf16.msrb.mxu1 %v1025_v51  ;;  %1048 = vmatpush.bf16.msra.mxu3 %v1025_v51 }
 0x1b3   : > { %768 = vmatmul.bf16.vlgmr.msrb.gmra.mxu0 %v931_v49  ;;  %773 = vmatmul.bf16.vlgmr.msra.gmra.mxu2 %v939_v50 }
 0x1b5   : > { %787 = vmatmul.bf16.vlgmr.msrb.gmra.mxu1 %v935_v52  ;;  %792 = vmatmul.bf16.vlgmr.msra.gmra.mxu3 %v943_v53 }
 0x1b6   : > { %v642_v5 = vpop.permute.xlu2 %641 }
 0x230   : > { %v769_v55 = vpop.f32.mrf.mxu0 }
 0x231   : > { %v770_v56 = vadd.f32 %v769_v55, %v627_v54 }
 0x232   : > { %v788_v57 = vpop.f32.mrf.mxu1 }
 0x233   : > { %v789_v58 = vadd.f32 %v788_v57, %v770_v56 }
 0x235   : > { %799 = vst.msk [vmem:[%s261_s7] sm:$0xff] %vm798_vm3, %v789_v58 }
 0x236   : > { %v774_v60 = vpop.f32.mrf.mxu2 }
 0x237   : > { %v775_v62 = vadd.f32 %v774_v60, %v637_v59 }
 0x238   : > { %v771_v63 = vpop.f32.mrf.mxu0  ;;  %v793_v0 = vpop.f32.mrf.mxu3 }
 0x239   : > { %v772_v1 = vadd.f32 %v771_v63, %v632_v61  ;;  %v794_v2 = vadd.f32 %v793_v0, %v775_v62 }
 0x23a   : > { %v790_v3 = vpop.f32.mrf.mxu1 }
 0x23b   : > { %801 = vst.msk [vmem:[%s261_s7 + $0x10] sm:$0xff] %vm798_vm3, %v794_v2  ;;  %v791_v4 = vadd.f32 %v790_v3, %v772_v1 }
 0x23d   : > { %800 = vst.msk [vmem:[%s261_s7 + $0x8] sm:$0xff] %vm798_vm3, %v791_v4 }
 0x23e   : > { %v776_v6 = vpop.f32.mrf.mxu2 }
 0x23f   : > { %v777_v7 = vadd.f32 %v776_v6, %v642_v5 }
 0x240   : > { %v795_v8 = vpop.f32.mrf.mxu3 }
 0x241   : > { %v796_v9 = vadd.f32 %v795_v8, %v777_v7 }
 0x243   : > { %802 = vst.msk [vmem:[%s261_s7 + $0x18] sm:$0xff] %vm798_vm3, %v796_v9 }
 0x244 PF: > { %s18_s20 = sadd.s32 1, %s1245_s20   ;;  %s1618_s15 = smov %s1229_s16 }
 0x245   : > { %p15_p2 = scmp.ge.s32.totalorder %s18_s20, 4   ;;  %s1619_s16 = smov %s1233_s17 }
 0x246   : > { %s1620_s17 = smov %s1356_s13  ;;  %s1621_s18 = smov %s1241_s19 }
 0x247   : > { %s1622_s19 = smov %s1624_s6  ;;  %17 = sbr.rel (!%p15_p2) target bundleno = 5 (0x5), region = 81 }
 0x24c   :  { %830 = vsyncpa [#allocation4], 1 }
 0x24d   :  { %832 = vsyncpa [#allocation4 + $0x1], 1 }
 0x24e   :  { %833 = vsyncpa [#allocation6], 1 }
 0x24f   :  { %835 = vsyncpa [#allocation6 + $0x1], 1 }

</bundles_post_ra>
